<compile_context>
chip_gen: v7x
topology: tpu7x:2x2x1
jax: 0.10.0
libtpu: 0.0.40
codegen_flags: <defaults>
</compile_context>

<pallas_src>
import functools

import jax
import jax.numpy as jnp
from jax import lax
from jax.experimental import pallas as pl
from jax.experimental.pallas import tpu as pltpu

NEG_SLOPE = 0.2  # LeakyReLU(0.2)


def _leaky(x):
    return jnp.where(x > 0, x, NEG_SLOPE * x)


def _residual_conv_kernel(x_ref, w1_ref, w2s_ref, out_ref, p1_ref, p2_ref,
                          *, H, W, Cin, Cout):
    """One batch element per grid step, channels-on-sublanes / spatial-on-lanes.

    x_ref   : (Cin, H*W)          flattened input image (batch dim squeezed)
    w1_ref  : (Cout, 9*Cin)       conv1 weights, column index = (kh*3+kw)*Cin + ci
    w2s_ref : (Cout, 9*Cout+Cin)  conv2 weights stacked with the 1x1 residual weights
    out_ref : (Cout, H*W)         lane-dense output
    p1_ref  : (9*Cin, H*W)        VMEM scratch: im2col patches of x
    p2_ref  : (9*Cout+Cin, H*W)   VMEM scratch: im2col patches of h1, plus raw x rows
    """
    HW = H * W
    f32 = jnp.float32

    x = x_ref[...].astype(f32)  # (Cin, HW)

    # Column index of each flattened spatial position (hoisted, reused by all taps).
    col = lax.broadcasted_iota(jnp.int32, (1, HW), 1) % W
    keep_pos = (col >= 1).astype(f32)        # used when dw == +1 (zero source column 0)
    keep_neg = (col < (W - 1)).astype(f32)   # used when dw == -1 (zero source column W-1)

    def stage_taps(v, dst_ref):
        # dst_ref[(kh*3+kw)*C + c, i*W+j] = v[c, (i+kh-1)*W + (j+kw-1)]  (0 outside image).
        # A linear (zero-filled) lane shift enforces the row bound exactly once the
        # column bound is masked, so only small border strips need explicit zeros.
        C = v.shape[0]
        masked = {-1: v * keep_neg, 0: v, 1: v * keep_pos}
        for kh in range(3):
            for kw in range(3):
                dh, dw = kh - 1, kw - 1
                delta = dh * W + dw
                vv = masked[dw]
                r0 = (kh * 3 + kw) * C
                if delta > 0:
                    dst_ref[r0:r0 + C, :HW - delta] = vv[:, delta:]
                    dst_ref[r0:r0 + C, HW - delta:] = jnp.zeros((C, delta), f32)
                elif delta < 0:
                    dst_ref[r0:r0 + C, :-delta] = jnp.zeros((C, -delta), f32)
                    dst_ref[r0:r0 + C, -delta:] = vv[:, :HW + delta]
                else:
                    dst_ref[r0:r0 + C, :] = vv

    # ---- conv1 (3x3, pad=1, no bias): im2col + ONE MXU dot, then LeakyReLU(0.2) ----
    stage_taps(x, p1_ref)
    h1 = _leaky(jnp.dot(w1_ref[...], p1_ref[...],
                        preferred_element_type=f32))            # (Cout, HW)

    # ---- conv2 (3x3) + 1x1 residual fused into ONE dot ----
    stage_taps(h1, p2_ref)
    p2_ref[9 * Cout:9 * Cout + Cin, :] = x                       # residual columns
    out = jnp.dot(w2s_ref[...], p2_ref[...],
                  preferred_element_type=f32)                    # (Cout, HW)

    # ---- final LeakyReLU(0.2), lane-dense store ----
    out_ref[...] = _leaky(out).astype(out_ref.dtype)


@jax.jit
def residual_conv_pallas(x_nchw, w1_oihw, w2_oihw, wres_oihw):
    """x_nchw: (B, Cin, H, W) f32; weights in PyTorch OIHW layout. Returns NCHW."""
    B, Cin, H, W = x_nchw.shape
    Cout = w1_oihw.shape[0]
    HW = H * W

    x = x_nchw.reshape(B, Cin, HW)  # free reshape, no transpose

    # (Cout, Cin, 3, 3) -> (Cout, 3, 3, Cin) -> (Cout, 9*Cin): col = (kh*3+kw)*Cin + ci
    w1 = jnp.transpose(w1_oihw, (0, 2, 3, 1)).reshape(Cout, 9 * Cin)
    w2 = jnp.transpose(w2_oihw, (0, 2, 3, 1)).reshape(Cout, 9 * Cout)
    wres = wres_oihw[:, :, 0, 0]                      # (Cout, Cin) 1x1 residual conv
    w2s = jnp.concatenate([w2, wres], axis=1)         # (Cout, 9*Cout + Cin)

    kernel = functools.partial(_residual_conv_kernel, H=H, W=W, Cin=Cin, Cout=Cout)

    out = pl.pallas_call(
        kernel,
        out_shape=jax.ShapeDtypeStruct((B, Cout, HW), jnp.float32),
        grid_spec=pltpu.PrefetchScalarGridSpec(
            num_scalar_prefetch=0,
            grid=(B,),
            in_specs=[
                pl.BlockSpec((None, Cin, HW), lambda b: (b, 0, 0)),
                pl.BlockSpec((Cout, 9 * Cin), lambda b: (0, 0)),
                pl.BlockSpec((Cout, 9 * Cout + Cin), lambda b: (0, 0)),
            ],
            out_specs=pl.BlockSpec((None, Cout, HW), lambda b: (b, 0, 0)),
            scratch_shapes=[
                pltpu.VMEM((9 * Cin, HW), jnp.float32),          # conv1 im2col patches
                pltpu.VMEM((9 * Cout + Cin, HW), jnp.float32),   # conv2 patches + x rows
            ],
        ),
        compiler_params=pltpu.CompilerParams(
            dimension_semantics=("parallel",)),  # feeds both TCs on v7x
    )(x, w1, w2s)

    return out.reshape(B, Cout, H, W)


def residual_conv_ref(x_nchw, w1_oihw, w2_oihw, wres_oihw):
    """Pure-JAX reference matching torch ResidualConv.forward (NCHW/OIHW)."""
    dn = ("NCHW", "OIHW", "NCHW")
    hi = lax.Precision.HIGHEST
    h1 = _leaky(lax.conv_general_dilated(x_nchw, w1_oihw, (1, 1), "SAME",
                                         dimension_numbers=dn, precision=hi))
    h2 = lax.conv_general_dilated(h1, w2_oihw, (1, 1), "SAME",
                                  dimension_numbers=dn, precision=hi)
    r = lax.conv_general_dilated(x_nchw, wres_oihw, (1, 1), "SAME",
                                 dimension_numbers=dn, precision=hi)
    return _leaky(h2 + r)


if __name__ == "__main__":
    # Shapes implied by the module: ResidualConv(nin=4, nout=8) on a
    # (batch=2, channels=4, 16, 16) NCHW input.  nin != nout, so the residual
    # path is the 1x1 conv (the identity variant for nin == nout is not exercised).
    B, Cin, Cout, H, W = 2, 4, 8, 16, 16

    key = jax.random.PRNGKey(0)
    kx, k1, k2, kr = jax.random.split(key, 4)

    # PyTorch conv weight layout is (out, in, kh, kw); deterministic init.
    w1_oihw = jax.random.normal(k1, (Cout, Cin, 3, 3), jnp.float32) * 0.1
    w2_oihw = jax.random.normal(k2, (Cout, Cout, 3, 3), jnp.float32) * 0.1
    wres_oihw = jax.random.normal(kr, (Cout, Cin, 1, 1), jnp.float32) * 0.1

    x_nchw = jax.random.normal(kx, (B, Cin, H, W), jnp.float32)

    out = residual_conv_pallas(x_nchw, w1_oihw, w2_oihw, wres_oihw)
    jax.block_until_ready(out)

    ref = residual_conv_ref(x_nchw, w1_oihw, w2_oihw, wres_oihw)

    assert out.shape == (B, Cout, H, W)
    max_err = float(jnp.max(jnp.abs(out - ref)))
    assert jnp.allclose(out, ref, atol=2e-4, rtol=2e-4), max_err

    print("KERNEL_OK")
</pallas_src>

<mosaic_0001>
module attributes {stable_mosaic.version = 11 : i64} {
  func.func @_residual_conv_kernel(%arg0: i32, %arg1: memref<1x4x256xf32, #tpu.memory_space<vmem>>, %arg2: memref<8x36xf32, #tpu.memory_space<vmem>>, %arg3: memref<8x76xf32, #tpu.memory_space<vmem>>, %arg4: memref<1x8x256xf32, #tpu.memory_space<vmem>>, %arg5: memref<36x256xf32, #tpu.memory_space<vmem>>, %arg6: memref<76x256xf32, #tpu.memory_space<vmem>>) attributes {dimension_semantics = [#tpu.dimension_semantics<parallel>], iteration_bounds = array<i64: 2>, scalar_prefetch = 0 : i64, scratch_operands = 2 : i64, tpu.core_type = #tpu.core_type<tc>, window_params = [{transform_indices = @transform_0, window_bounds = array<i64: 1, 4, 256>}, {pipeline_mode = #tpu.pipeline_mode<synchronous>, transform_indices = @transform_1, window_bounds = array<i64: 8, 36>}, {pipeline_mode = #tpu.pipeline_mode<synchronous>, transform_indices = @transform_2, window_bounds = array<i64: 8, 76>}, {transform_indices = @transform_3, window_bounds = array<i64: 1, 8, 256>}]} {
    %c0 = arith.constant 0 : index
    %c0_0 = arith.constant 0 : index
    %c0_1 = arith.constant 0 : index
    %0 = vector.load %arg1[%c0, %c0_0, %c0_1] : memref<1x4x256xf32, #tpu.memory_space<vmem>>, vector<1x4x256xf32>
    %1 = vector.shape_cast %0 : vector<1x4x256xf32> to vector<4x256xf32>
    %2 = tpu.iota {dimensions = array<i32: 1>} : vector<1x256xi32>
    %c16_i32 = arith.constant 16 : i32
    %c0_i32 = arith.constant 0 : i32
    %3 = arith.cmpi eq, %c16_i32, %c0_i32 : i32
    %c1_i32 = arith.constant 1 : i32
    %4 = arith.select %3, %c1_i32, %c16_i32 : i32
    %5 = vector.broadcast %4 : i32 to vector<1x256xi32>
    %6 = arith.remsi %2, %5 : vector<1x256xi32>
    %c0_i32_2 = arith.constant 0 : i32
    %7 = vector.broadcast %c0_i32_2 : i32 to vector<1x256xi32>
    %8 = arith.cmpi ne, %6, %7 : vector<1x256xi32>
    %c0_i32_3 = arith.constant 0 : i32
    %9 = vector.broadcast %c0_i32_3 : i32 to vector<1x256xi32>
    %10 = arith.cmpi slt, %6, %9 : vector<1x256xi32>
    %c0_i32_4 = arith.constant 0 : i32
    %11 = arith.cmpi slt, %4, %c0_i32_4 : i32
    %12 = vector.broadcast %11 : i1 to vector<1x256xi1>
    %13 = vector.broadcast %12 : vector<1x256xi1> to vector<1x256xi1>
    %14 = arith.xori %10, %13 : vector<1x256xi1>
    %15 = arith.andi %14, %8 : vector<1x256xi1>
    %16 = vector.broadcast %4 : i32 to vector<1x256xi32>
    %17 = arith.addi %6, %16 : vector<1x256xi32>
    %18 = arith.select %15, %17, %6 : vector<1x256xi1>, vector<1x256xi32>
    %c1_i32_5 = arith.constant 1 : i32
    %19 = vector.broadcast %c1_i32_5 : i32 to vector<1x256xi32>
    %20 = arith.cmpi sge, %18, %19 : vector<1x256xi32>
    %21 = arith.extui %20 : vector<1x256xi1> to vector<1x256xi32>
    %22 = arith.sitofp %21 : vector<1x256xi32> to vector<1x256xf32>
    %c15_i32 = arith.constant 15 : i32
    %23 = vector.broadcast %c15_i32 : i32 to vector<1x256xi32>
    %24 = arith.cmpi slt, %18, %23 : vector<1x256xi32>
    %25 = arith.extui %24 : vector<1x256xi1> to vector<1x256xi32>
    %26 = arith.sitofp %25 : vector<1x256xi32> to vector<1x256xf32>
    %27 = vector.broadcast %26 : vector<1x256xf32> to vector<4x256xf32>
    %28 = arith.mulf %1, %27 : vector<4x256xf32>
    %29 = vector.broadcast %22 : vector<1x256xf32> to vector<4x256xf32>
    %30 = arith.mulf %1, %29 : vector<4x256xf32>
    %cst = arith.constant 0.000000e+00 : f32
    %31 = vector.broadcast %cst : f32 to vector<4x17xf32>
    %c0_6 = arith.constant 0 : index
    %c0_7 = arith.constant 0 : index
    %32 = vector.load %arg5[%c0_6, %c0_7] : memref<36x256xf32, #tpu.memory_space<vmem>>, vector<4x17xf32>
    tpu.vector_store %arg5[%c0_6, %c0_7], %31 {strides = array<i32>} : memref<36x256xf32, #tpu.memory_space<vmem>>, vector<4x17xf32>,
    %33 = vector.extract_strided_slice %28 {offsets = [0, 0], sizes = [4, 239], strides = [1, 1]} : vector<4x256xf32> to vector<4x239xf32>
    %c0_8 = arith.constant 0 : index
    %c17 = arith.constant 17 : index
    %34 = vector.load %arg5[%c0_8, %c17] : memref<36x256xf32, #tpu.memory_space<vmem>>, vector<4x239xf32>
    tpu.vector_store %arg5[%c0_8, %c17], %33 {strides = array<i32>} : memref<36x256xf32, #tpu.memory_space<vmem>>, vector<4x239xf32>,
    %cst_9 = arith.constant 0.000000e+00 : f32
    %35 = vector.broadcast %cst_9 : f32 to vector<4x16xf32>
    %c4 = arith.constant 4 : index
    %c0_10 = arith.constant 0 : index
    %36 = vector.load %arg5[%c4, %c0_10] : memref<36x256xf32, #tpu.memory_space<vmem>>, vector<4x16xf32>
    tpu.vector_store %arg5[%c4, %c0_10], %35 {strides = array<i32>} : memref<36x256xf32, #tpu.memory_space<vmem>>, vector<4x16xf32>,
    %37 = vector.extract_strided_slice %1 {offsets = [0, 0], sizes = [4, 240], strides = [1, 1]} : vector<4x256xf32> to vector<4x240xf32>
    %c4_11 = arith.constant 4 : index
    %c16 = arith.constant 16 : index
    %38 = vector.load %arg5[%c4_11, %c16] : memref<36x256xf32, #tpu.memory_space<vmem>>, vector<4x240xf32>
    tpu.vector_store %arg5[%c4_11, %c16], %37 {strides = array<i32>} : memref<36x256xf32, #tpu.memory_space<vmem>>, vector<4x240xf32>,
    %cst_12 = arith.constant 0.000000e+00 : f32
    %39 = vector.broadcast %cst_12 : f32 to vector<4x15xf32>
    %c8 = arith.constant 8 : index
    %c0_13 = arith.constant 0 : index
    %40 = vector.load %arg5[%c8, %c0_13] : memref<36x256xf32, #tpu.memory_space<vmem>>, vector<4x15xf32>
    tpu.vector_store %arg5[%c8, %c0_13], %39 {strides = array<i32>} : memref<36x256xf32, #tpu.memory_space<vmem>>, vector<4x15xf32>,
    %41 = vector.extract_strided_slice %30 {offsets = [0, 0], sizes = [4, 241], strides = [1, 1]} : vector<4x256xf32> to vector<4x241xf32>
    %c8_14 = arith.constant 8 : index
    %c15 = arith.constant 15 : index
    %42 = vector.load %arg5[%c8_14, %c15] : memref<36x256xf32, #tpu.memory_space<vmem>>, vector<4x241xf32>
    tpu.vector_store %arg5[%c8_14, %c15], %41 {strides = array<i32>} : memref<36x256xf32, #tpu.memory_space<vmem>>, vector<4x241xf32>,
    %cst_15 = arith.constant 0.000000e+00 : f32
    %43 = vector.broadcast %cst_15 : f32 to vector<4x1xf32>
    %c12 = arith.constant 12 : index
    %c0_16 = arith.constant 0 : index
    %44 = vector.load %arg5[%c12, %c0_16] : memref<36x256xf32, #tpu.memory_space<vmem>>, vector<4x1xf32>
    tpu.vector_store %arg5[%c12, %c0_16], %43 {strides = array<i32>} : memref<36x256xf32, #tpu.memory_space<vmem>>, vector<4x1xf32>,
    %45 = vector.extract_strided_slice %28 {offsets = [0, 0], sizes = [4, 255], strides = [1, 1]} : vector<4x256xf32> to vector<4x255xf32>
    %c12_17 = arith.constant 12 : index
    %c1 = arith.constant 1 : index
    %46 = vector.load %arg5[%c12_17, %c1] : memref<36x256xf32, #tpu.memory_space<vmem>>, vector<4x255xf32>
    tpu.vector_store %arg5[%c12_17, %c1], %45 {strides = array<i32>} : memref<36x256xf32, #tpu.memory_space<vmem>>, vector<4x255xf32>,
    %c16_18 = arith.constant 16 : index
    %c0_19 = arith.constant 0 : index
    %47 = vector.load %arg5[%c16_18, %c0_19] : memref<36x256xf32, #tpu.memory_space<vmem>>, vector<4x256xf32>
    tpu.vector_store %arg5[%c16_18, %c0_19], %1 {strides = array<i32>} : memref<36x256xf32, #tpu.memory_space<vmem>>, vector<4x256xf32>,
    %48 = vector.extract_strided_slice %30 {offsets = [0, 1], sizes = [4, 255], strides = [1, 1]} : vector<4x256xf32> to vector<4x255xf32>
    %c20 = arith.constant 20 : index
    %c0_20 = arith.constant 0 : index
    %49 = vector.load %arg5[%c20, %c0_20] : memref<36x256xf32, #tpu.memory_space<vmem>>, vector<4x255xf32>
    tpu.vector_store %arg5[%c20, %c0_20], %48 {strides = array<i32>} : memref<36x256xf32, #tpu.memory_space<vmem>>, vector<4x255xf32>,
    %cst_21 = arith.constant 0.000000e+00 : f32
    %50 = vector.broadcast %cst_21 : f32 to vector<4x1xf32>
    %c20_22 = arith.constant 20 : index
    %c255 = arith.constant 255 : index
    %51 = vector.load %arg5[%c20_22, %c255] : memref<36x256xf32, #tpu.memory_space<vmem>>, vector<4x1xf32>
    tpu.vector_store %arg5[%c20_22, %c255], %50 {strides = array<i32>} : memref<36x256xf32, #tpu.memory_space<vmem>>, vector<4x1xf32>,
    %52 = vector.extract_strided_slice %28 {offsets = [0, 15], sizes = [4, 241], strides = [1, 1]} : vector<4x256xf32> to vector<4x241xf32>
    %c24 = arith.constant 24 : index
    %c0_23 = arith.constant 0 : index
    %53 = vector.load %arg5[%c24, %c0_23] : memref<36x256xf32, #tpu.memory_space<vmem>>, vector<4x241xf32>
    tpu.vector_store %arg5[%c24, %c0_23], %52 {strides = array<i32>} : memref<36x256xf32, #tpu.memory_space<vmem>>, vector<4x241xf32>,
    %cst_24 = arith.constant 0.000000e+00 : f32
    %54 = vector.broadcast %cst_24 : f32 to vector<4x15xf32>
    %c24_25 = arith.constant 24 : index
    %c241 = arith.constant 241 : index
    %55 = vector.load %arg5[%c24_25, %c241] : memref<36x256xf32, #tpu.memory_space<vmem>>, vector<4x15xf32>
    tpu.vector_store %arg5[%c24_25, %c241], %54 {strides = array<i32>} : memref<36x256xf32, #tpu.memory_space<vmem>>, vector<4x15xf32>,
    %56 = vector.extract_strided_slice %1 {offsets = [0, 16], sizes = [4, 240], strides = [1, 1]} : vector<4x256xf32> to vector<4x240xf32>
    %c28 = arith.constant 28 : index
    %c0_26 = arith.constant 0 : index
    %57 = vector.load %arg5[%c28, %c0_26] : memref<36x256xf32, #tpu.memory_space<vmem>>, vector<4x240xf32>
    tpu.vector_store %arg5[%c28, %c0_26], %56 {strides = array<i32>} : memref<36x256xf32, #tpu.memory_space<vmem>>, vector<4x240xf32>,
    %cst_27 = arith.constant 0.000000e+00 : f32
    %58 = vector.broadcast %cst_27 : f32 to vector<4x16xf32>
    %c28_28 = arith.constant 28 : index
    %c240 = arith.constant 240 : index
    %59 = vector.load %arg5[%c28_28, %c240] : memref<36x256xf32, #tpu.memory_space<vmem>>, vector<4x16xf32>
    tpu.vector_store %arg5[%c28_28, %c240], %58 {strides = array<i32>} : memref<36x256xf32, #tpu.memory_space<vmem>>, vector<4x16xf32>,
    %60 = vector.extract_strided_slice %30 {offsets = [0, 17], sizes = [4, 239], strides = [1, 1]} : vector<4x256xf32> to vector<4x239xf32>
    %c32 = arith.constant 32 : index
    %c0_29 = arith.constant 0 : index
    %61 = vector.load %arg5[%c32, %c0_29] : memref<36x256xf32, #tpu.memory_space<vmem>>, vector<4x239xf32>
    tpu.vector_store %arg5[%c32, %c0_29], %60 {strides = array<i32>} : memref<36x256xf32, #tpu.memory_space<vmem>>, vector<4x239xf32>,
    %cst_30 = arith.constant 0.000000e+00 : f32
    %62 = vector.broadcast %cst_30 : f32 to vector<4x17xf32>
    %c32_31 = arith.constant 32 : index
    %c239 = arith.constant 239 : index
    %63 = vector.load %arg5[%c32_31, %c239] : memref<36x256xf32, #tpu.memory_space<vmem>>, vector<4x17xf32>
    tpu.vector_store %arg5[%c32_31, %c239], %62 {strides = array<i32>} : memref<36x256xf32, #tpu.memory_space<vmem>>, vector<4x17xf32>,
    %c0_32 = arith.constant 0 : index
    %c0_33 = arith.constant 0 : index
    %64 = vector.load %arg2[%c0_32, %c0_33] : memref<8x36xf32, #tpu.memory_space<vmem>>, vector<8x36xf32>
    %c0_34 = arith.constant 0 : index
    %c0_35 = arith.constant 0 : index
    %65 = vector.load %arg5[%c0_34, %c0_35] : memref<36x256xf32, #tpu.memory_space<vmem>>, vector<36x256xf32>
    %cst_36 = arith.constant dense<0.000000e+00> : vector<8x256xf32>
    %66 = tpu.matmul %64, %65, %cst_36 {dimension_numbers = #tpu.dot_dimension_numbers<[1], [0], [0], [1], [0, 0, 1, 1], [], []>} : vector<8x36xf32>, vector<36x256xf32>, vector<8x256xf32> -> vector<8x256xf32>
    %cst_37 = arith.constant 0.000000e+00 : f32
    %67 = vector.broadcast %cst_37 : f32 to vector<8x256xf32>
    %68 = arith.cmpf ogt, %66, %67 : vector<8x256xf32>
    %cst_38 = arith.constant 2.000000e-01 : f32
    %69 = vector.broadcast %cst_38 : f32 to vector<8x256xf32>
    %70 = arith.mulf %69, %66 : vector<8x256xf32>
    %71 = arith.select %68, %66, %70 : vector<8x256xi1>, vector<8x256xf32>
    %72 = vector.broadcast %26 : vector<1x256xf32> to vector<8x256xf32>
    %73 = arith.mulf %71, %72 : vector<8x256xf32>
    %74 = vector.broadcast %22 : vector<1x256xf32> to vector<8x256xf32>
    %75 = arith.mulf %71, %74 : vector<8x256xf32>
    %cst_39 = arith.constant 0.000000e+00 : f32
    %76 = vector.broadcast %cst_39 : f32 to vector<8x17xf32>
    %c0_40 = arith.constant 0 : index
    %c0_41 = arith.constant 0 : index
    %77 = vector.load %arg6[%c0_40, %c0_41] : memref<76x256xf32, #tpu.memory_space<vmem>>, vector<8x17xf32>
    tpu.vector_store %arg6[%c0_40, %c0_41], %76 {strides = array<i32>} : memref<76x256xf32, #tpu.memory_space<vmem>>, vector<8x17xf32>,
    %78 = vector.extract_strided_slice %73 {offsets = [0, 0], sizes = [8, 239], strides = [1, 1]} : vector<8x256xf32> to vector<8x239xf32>
    %c0_42 = arith.constant 0 : index
    %c17_43 = arith.constant 17 : index
    %79 = vector.load %arg6[%c0_42, %c17_43] : memref<76x256xf32, #tpu.memory_space<vmem>>, vector<8x239xf32>
    tpu.vector_store %arg6[%c0_42, %c17_43], %78 {strides = array<i32>} : memref<76x256xf32, #tpu.memory_space<vmem>>, vector<8x239xf32>,
    %cst_44 = arith.constant 0.000000e+00 : f32
    %80 = vector.broadcast %cst_44 : f32 to vector<8x16xf32>
    %c8_45 = arith.constant 8 : index
    %c0_46 = arith.constant 0 : index
    %81 = vector.load %arg6[%c8_45, %c0_46] : memref<76x256xf32, #tpu.memory_space<vmem>>, vector<8x16xf32>
    tpu.vector_store %arg6[%c8_45, %c0_46], %80 {strides = array<i32>} : memref<76x256xf32, #tpu.memory_space<vmem>>, vector<8x16xf32>,
    %82 = vector.extract_strided_slice %71 {offsets = [0, 0], sizes = [8, 240], strides = [1, 1]} : vector<8x256xf32> to vector<8x240xf32>
    %c8_47 = arith.constant 8 : index
    %c16_48 = arith.constant 16 : index
    %83 = vector.load %arg6[%c8_47, %c16_48] : memref<76x256xf32, #tpu.memory_space<vmem>>, vector<8x240xf32>
    tpu.vector_store %arg6[%c8_47, %c16_48], %82 {strides = array<i32>} : memref<76x256xf32, #tpu.memory_space<vmem>>, vector<8x240xf32>,
    %cst_49 = arith.constant 0.000000e+00 : f32
    %84 = vector.broadcast %cst_49 : f32 to vector<8x15xf32>
    %c16_50 = arith.constant 16 : index
    %c0_51 = arith.constant 0 : index
    %85 = vector.load %arg6[%c16_50, %c0_51] : memref<76x256xf32, #tpu.memory_space<vmem>>, vector<8x15xf32>
    tpu.vector_store %arg6[%c16_50, %c0_51], %84 {strides = array<i32>} : memref<76x256xf32, #tpu.memory_space<vmem>>, vector<8x15xf32>,
    %86 = vector.extract_strided_slice %75 {offsets = [0, 0], sizes = [8, 241], strides = [1, 1]} : vector<8x256xf32> to vector<8x241xf32>
    %c16_52 = arith.constant 16 : index
    %c15_53 = arith.constant 15 : index
    %87 = vector.load %arg6[%c16_52, %c15_53] : memref<76x256xf32, #tpu.memory_space<vmem>>, vector<8x241xf32>
    tpu.vector_store %arg6[%c16_52, %c15_53], %86 {strides = array<i32>} : memref<76x256xf32, #tpu.memory_space<vmem>>, vector<8x241xf32>,
    %cst_54 = arith.constant 0.000000e+00 : f32
    %88 = vector.broadcast %cst_54 : f32 to vector<8x1xf32>
    %c24_55 = arith.constant 24 : index
    %c0_56 = arith.constant 0 : index
    %89 = vector.load %arg6[%c24_55, %c0_56] : memref<76x256xf32, #tpu.memory_space<vmem>>, vector<8x1xf32>
    tpu.vector_store %arg6[%c24_55, %c0_56], %88 {strides = array<i32>} : memref<76x256xf32, #tpu.memory_space<vmem>>, vector<8x1xf32>,
    %90 = vector.extract_strided_slice %73 {offsets = [0, 0], sizes = [8, 255], strides = [1, 1]} : vector<8x256xf32> to vector<8x255xf32>
    %c24_57 = arith.constant 24 : index
    %c1_58 = arith.constant 1 : index
    %91 = vector.load %arg6[%c24_57, %c1_58] : memref<76x256xf32, #tpu.memory_space<vmem>>, vector<8x255xf32>
    tpu.vector_store %arg6[%c24_57, %c1_58], %90 {strides = array<i32>} : memref<76x256xf32, #tpu.memory_space<vmem>>, vector<8x255xf32>,
    %c32_59 = arith.constant 32 : index
    %c0_60 = arith.constant 0 : index
    %92 = vector.load %arg6[%c32_59, %c0_60] : memref<76x256xf32, #tpu.memory_space<vmem>>, vector<8x256xf32>
    tpu.vector_store %arg6[%c32_59, %c0_60], %71 {strides = array<i32>} : memref<76x256xf32, #tpu.memory_space<vmem>>, vector<8x256xf32>,
    %93 = vector.extract_strided_slice %75 {offsets = [0, 1], sizes = [8, 255], strides = [1, 1]} : vector<8x256xf32> to vector<8x255xf32>
    %c40 = arith.constant 40 : index
    %c0_61 = arith.constant 0 : index
    %94 = vector.load %arg6[%c40, %c0_61] : memref<76x256xf32, #tpu.memory_space<vmem>>, vector<8x255xf32>
    tpu.vector_store %arg6[%c40, %c0_61], %93 {strides = array<i32>} : memref<76x256xf32, #tpu.memory_space<vmem>>, vector<8x255xf32>,
    %cst_62 = arith.constant 0.000000e+00 : f32
    %95 = vector.broadcast %cst_62 : f32 to vector<8x1xf32>
    %c40_63 = arith.constant 40 : index
    %c255_64 = arith.constant 255 : index
    %96 = vector.load %arg6[%c40_63, %c255_64] : memref<76x256xf32, #tpu.memory_space<vmem>>, vector<8x1xf32>
    tpu.vector_store %arg6[%c40_63, %c255_64], %95 {strides = array<i32>} : memref<76x256xf32, #tpu.memory_space<vmem>>, vector<8x1xf32>,
    %97 = vector.extract_strided_slice %73 {offsets = [0, 15], sizes = [8, 241], strides = [1, 1]} : vector<8x256xf32> to vector<8x241xf32>
    %c48 = arith.constant 48 : index
    %c0_65 = arith.constant 0 : index
    %98 = vector.load %arg6[%c48, %c0_65] : memref<76x256xf32, #tpu.memory_space<vmem>>, vector<8x241xf32>
    tpu.vector_store %arg6[%c48, %c0_65], %97 {strides = array<i32>} : memref<76x256xf32, #tpu.memory_space<vmem>>, vector<8x241xf32>,
    %cst_66 = arith.constant 0.000000e+00 : f32
    %99 = vector.broadcast %cst_66 : f32 to vector<8x15xf32>
    %c48_67 = arith.constant 48 : index
    %c241_68 = arith.constant 241 : index
    %100 = vector.load %arg6[%c48_67, %c241_68] : memref<76x256xf32, #tpu.memory_space<vmem>>, vector<8x15xf32>
    tpu.vector_store %arg6[%c48_67, %c241_68], %99 {strides = array<i32>} : memref<76x256xf32, #tpu.memory_space<vmem>>, vector<8x15xf32>,
    %101 = vector.extract_strided_slice %71 {offsets = [0, 16], sizes = [8, 240], strides = [1, 1]} : vector<8x256xf32> to vector<8x240xf32>
    %c56 = arith.constant 56 : index
    %c0_69 = arith.constant 0 : index
    %102 = vector.load %arg6[%c56, %c0_69] : memref<76x256xf32, #tpu.memory_space<vmem>>, vector<8x240xf32>
    tpu.vector_store %arg6[%c56, %c0_69], %101 {strides = array<i32>} : memref<76x256xf32, #tpu.memory_space<vmem>>, vector<8x240xf32>,
    %cst_70 = arith.constant 0.000000e+00 : f32
    %103 = vector.broadcast %cst_70 : f32 to vector<8x16xf32>
    %c56_71 = arith.constant 56 : index
    %c240_72 = arith.constant 240 : index
    %104 = vector.load %arg6[%c56_71, %c240_72] : memref<76x256xf32, #tpu.memory_space<vmem>>, vector<8x16xf32>
    tpu.vector_store %arg6[%c56_71, %c240_72], %103 {strides = array<i32>} : memref<76x256xf32, #tpu.memory_space<vmem>>, vector<8x16xf32>,
    %105 = vector.extract_strided_slice %75 {offsets = [0, 17], sizes = [8, 239], strides = [1, 1]} : vector<8x256xf32> to vector<8x239xf32>
    %c64 = arith.constant 64 : index
    %c0_73 = arith.constant 0 : index
    %106 = vector.load %arg6[%c64, %c0_73] : memref<76x256xf32, #tpu.memory_space<vmem>>, vector<8x239xf32>
    tpu.vector_store %arg6[%c64, %c0_73], %105 {strides = array<i32>} : memref<76x256xf32, #tpu.memory_space<vmem>>, vector<8x239xf32>,
    %cst_74 = arith.constant 0.000000e+00 : f32
    %107 = vector.broadcast %cst_74 : f32 to vector<8x17xf32>
    %c64_75 = arith.constant 64 : index
    %c239_76 = arith.constant 239 : index
    %108 = vector.load %arg6[%c64_75, %c239_76] : memref<76x256xf32, #tpu.memory_space<vmem>>, vector<8x17xf32>
    tpu.vector_store %arg6[%c64_75, %c239_76], %107 {strides = array<i32>} : memref<76x256xf32, #tpu.memory_space<vmem>>, vector<8x17xf32>,
    %c72 = arith.constant 72 : index
    %c0_77 = arith.constant 0 : index
    %109 = vector.load %arg6[%c72, %c0_77] : memref<76x256xf32, #tpu.memory_space<vmem>>, vector<4x256xf32>
    tpu.vector_store %arg6[%c72, %c0_77], %1 {strides = array<i32>} : memref<76x256xf32, #tpu.memory_space<vmem>>, vector<4x256xf32>,
    %c0_78 = arith.constant 0 : index
    %c0_79 = arith.constant 0 : index
    %110 = vector.load %arg3[%c0_78, %c0_79] : memref<8x76xf32, #tpu.memory_space<vmem>>, vector<8x76xf32>
    %c0_80 = arith.constant 0 : index
    %c0_81 = arith.constant 0 : index
    %111 = vector.load %arg6[%c0_80, %c0_81] : memref<76x256xf32, #tpu.memory_space<vmem>>, vector<76x256xf32>
    %cst_82 = arith.constant dense<0.000000e+00> : vector<8x256xf32>
    %112 = tpu.matmul %110, %111, %cst_82 {dimension_numbers = #tpu.dot_dimension_numbers<[1], [0], [0], [1], [0, 0, 1, 1], [], []>} : vector<8x76xf32>, vector<76x256xf32>, vector<8x256xf32> -> vector<8x256xf32>
    %cst_83 = arith.constant 0.000000e+00 : f32
    %113 = vector.broadcast %cst_83 : f32 to vector<8x256xf32>
    %114 = arith.cmpf ogt, %112, %113 : vector<8x256xf32>
    %cst_84 = arith.constant 2.000000e-01 : f32
    %115 = vector.broadcast %cst_84 : f32 to vector<8x256xf32>
    %116 = arith.mulf %115, %112 : vector<8x256xf32>
    %117 = arith.select %114, %112, %116 : vector<8x256xi1>, vector<8x256xf32>
    %c0_85 = arith.constant 0 : index
    %c0_86 = arith.constant 0 : index
    %c0_87 = arith.constant 0 : index
    %118 = vector.load %arg4[%c0_85, %c0_86, %c0_87] : memref<1x8x256xf32, #tpu.memory_space<vmem>>, vector<1x8x256xf32>
    %119 = vector.shape_cast %118 : vector<1x8x256xf32> to vector<8x256xf32>
    %120 = vector.shape_cast %117 : vector<8x256xf32> to vector<1x8x256xf32>
    tpu.vector_store %arg4[%c0_85, %c0_86, %c0_87], %120 {strides = array<i32>} : memref<1x8x256xf32, #tpu.memory_space<vmem>>, vector<1x8x256xf32>,
    return
  }
  func.func @transform_0(%arg0: i32) -> (i32, i32, i32) {
    %c0_i32 = arith.constant 0 : i32
    %c0_i32_0 = arith.constant 0 : i32
    %c0_i32_1 = arith.constant 0 : i32
    return %arg0, %c0_i32, %c0_i32_0 : i32, i32, i32
  }
  func.func @transform_1(%arg0: i32) -> (i32, i32) {
    %c0_i32 = arith.constant 0 : i32
    %c0_i32_0 = arith.constant 0 : i32
    %c0_i32_1 = arith.constant 0 : i32
    return %c0_i32, %c0_i32_0 : i32, i32
  }
  func.func @transform_2(%arg0: i32) -> (i32, i32) {
    %c0_i32 = arith.constant 0 : i32
    %c0_i32_0 = arith.constant 0 : i32
    %c0_i32_1 = arith.constant 0 : i32
    return %c0_i32, %c0_i32_0 : i32, i32
  }
  func.func @transform_3(%arg0: i32) -> (i32, i32, i32) {
    %c0_i32 = arith.constant 0 : i32
    %c0_i32_0 = arith.constant 0 : i32
    %c0_i32_1 = arith.constant 0 : i32
    return %arg0, %c0_i32, %c0_i32_0 : i32, i32, i32
  }
}

</mosaic_0001>

<bundles_post_ra>
// kernel: residual_conv_pallas.1
= control target key start
LH: loop header
LB: loop body
LE: loop exit
PB: predicated region body
PF: predicated region fallthrough
CT: control target
= control target key end

     0   :  { %s814_s12 = smov 0   ;;  %s952_s0 = inlined_call_operand.vmem [shape: f32[2,4,256], index: 0, kind: input, shape index: {}]   ;;  %s953_s1 = inlined_call_operand.vmem [shape: f32[8,36], index: 1, kind: input, shape index: {}]   ;;  %s954_s2 = inlined_call_operand.vmem [shape: f32[8,76], index: 2, kind: input, shape index: {}]   ;;  %s955_s3 = inlined_call_operand.vmem [shape: f32[2,8,256], index: 3, kind: output, shape index: {}]  }
   0x1 LB: > { %s703_s13 = sadd.s32 4294967295, %s782_s12   ;;  %p707_p0 = scmp.ge.s32.totalorder %s782_s12, 1  ;;  %s782_s12 = sphi %s814_s12, %s13_s12  }
   0x2   : > { %p137_p1 = scmp.lt.s32.totalorder %s782_s12, 3 }
   0x4   : > { %p138_p2 = pnand %p707_p0, %p137_p1 }
   0x5   : > { %p161_p3 = scmp.lt.s32.totalorder (!%p138_p2), %s703_s13, 1  ;;  %v172_v0 = vlaneseq (!%p138_p2)  ;;  %vm236_vm0 = vcmask (!%p138_p2), 130052   ;;  %vm244_vm1 = vcmask (!%p138_p2), 130048   ;;  %v784_v1 = vmov (!%p138_p2), 0.0   ;;  %s785_s18 = smov (!%p138_p2), 16   ;;  %v337_v59 = vld [vmem:[%s953_s1] sm:$0xff] (!%p138_p2) }
   0x6   : > { %141 = sbr.rel (%p138_p2) target bundleno = 764 (0x2fc), region = 32  ;;  %237 = vst.msk [vmem:[#allocation2] sm:$0xf0] (!%p138_p2), %vm236_vm0, %v784_v1  ;;  %vm221_vm2 = vcmask (!%p138_p2), 134144   ;;  %vm251_vm3 = vcmask (!%p138_p2), 117760   ;;  %423 = vmatprep.mubr.f32.mxu0 (!%p138_p2), %v784_v1  ;;  %633 = vmatprep.mubr.f32.mxu1 (!%p138_p2), %v784_v1  ;;  %vm259_vm4 = vcmask (!%p138_p2), 121856  }
   0x7   : > { %453 = vst.msk [vmem:[#allocation3 + $0x10] sm:$0xff] (!%p138_p2), %vm244_vm1, %v784_v1  ;;  %v173_v2 = vand.u32 (!%p138_p2), 127, %v172_v0  ;;  %vm229_vm9 = vcmask (!%p138_p2), 138240   ;;  %s786_s19 = smov (!%p138_p2), 17   ;;  %s787_s20 = smov (!%p138_p2), 1   ;;  %vm266_vm10 = vcmask (!%p138_p2), 7172  }
   0x8   : > { %222 = vst.msk [vmem:[#allocation2] sm:$0xf] (!%p138_p2), %vm221_vm2, %v784_v1  ;;  %vm273_vm11 = vcmask (!%p138_p2), 7168   ;;  %s788_s21 = smov (!%p138_p2), 15   ;;  %s789_s22 = smov (!%p138_p2), 127   ;;  %vm248_vm12 = vcmask (!%p138_p2), 1047684  }
   0x9   : > { %252 = vst.msk [vmem:[#allocation2 + $0x10] sm:$0xf] (!%p138_p2), %vm251_vm3, %v784_v1  ;;  %v174_v3 = vadd.s32 (!%p138_p2), 128, %v173_v2  ;;  %v179_v4 = vand.u32 (!%p138_p2), 15, %v173_v2  ;;  %s790_s23 = smov (!%p138_p2), 113   ;;  %s791_s24 = smov (!%p138_p2), 112  }
   0xa   : > { %466 = vst.msk [vmem:[#allocation3 + $0x20] sm:$0xff] (!%p138_p2), %vm259_vm4, %v784_v1  ;;  %s792_s25 = smov (!%p138_p2), 111   ;;  %vm233_vm13 = vcmask (!%p138_p2), 1043592   ;;  %vm263_vm14 = vcmask (!%p138_p2), 1043576   ;;  %vm294_vm15 = vcmask (!%p138_p2), 1039364   ;;  %vm296_vm0 = vcmask (!%p138_p2), 1048572  }
   0xb   : > { %v186_v6 = vand.u32 (!%p138_p2), 15, %v174_v3  ;;  %vm205_vm5 = vcmp.lt.s32.totalorder (!%p138_p2), %v179_v4, 15  ;;  %vm199_vm6 = vcmp.ge.s32.totalorder (!%p138_p2), %v179_v4, 1  ;;  %440 = vst.msk [vmem:[#allocation3] sm:$0xff] (!%p138_p2), %vm229_vm9, %v784_v1  ;;  %vm307_vm2 = vcmask (!%p138_p2), 920576  }
   0xc   : > { %v839_v9 = vsel (!%p138_p2), %vm205_vm5, 1.0, %v784_v1  ;;  %v842_v10 = vsel (!%p138_p2), %vm199_vm6, 1.0, %v784_v1  ;;  %267 = vst.msk [vmem:[#allocation2 + $0x10] sm:$0xf0] (!%p138_p2), %vm266_vm10, %v784_v1  ;;  %vm309_vm3 = vcmask (!%p138_p2), 1044360   ;;  %vm289_vm5 = vcmask (!%p138_p2), 1039360  }
   0xd   : > { %s957_s13 = smov (!%p161_p3, %s703_s13), 1  ;;  %vm206_vm7 = vcmp.lt.s32.totalorder %v186_v6, 15  ;;  %vm200_vm8 = vcmp.ge.s32.totalorder %v186_v6, 1  ;;  %479 = vst.msk [vmem:[#allocation3 + $0x30] sm:$0xff] %vm273_vm11, %v784_v1  ;;  %vm277_vm6 = vcmask 1047564   ;;  %vm322_vm10 = vcmask 1048452  }
   0xe   : > { %s724_s14 = sshll.u32 %s957_s13, 3  ;;  %v845_v11 = vsel %vm206_vm7, 1.0, %v784_v1  ;;  %v848_v12 = vsel %vm200_vm8, 1.0, %v784_v1  ;;  %vm315_vm7 = vcmask 916480   ;;  %vm320_vm8 = vcmask 916484   ;;  %s725_s30 = sshll.u32 %s957_s13, 4 }
   0xf   : > { %s165_s17 = scalar_lea.vmem %s952_s0, %s724_s14  ;;  %v213_v13 = vcombine.low %v839_v9, %v845_v11  ;;  %v218_v14 = vcombine.low %v842_v10, %v848_v12  ;;  %s170_s6 = scalar_lea.vmem %s955_s3, %s725_s30 }
  0x10   : > { %v171_v5 = vld [vmem:[%s165_s17] sm:$0xff] }
  0x11   : > { %242 = vrot.lane.b32.xlu1 %v171_v5, %s785_s18  ;;  %v280_v7 = vcombine.high %v171_v5, %v171_v5  ;;  %282 = vst [vmem:[#allocation2 + $0x20] sm:$0xf] %v171_v5  ;;  %536 = vst [vmem:[#allocation3 + $0x90] sm:$0xf] %v171_v5  ;;  %v239_v8 = vcombine.low %v171_v5, %v171_v5  ;;  %v215_v15 = vmul.f32 %v213_v13, %v171_v5 }
  0x12   : > { %v220_v16 = vmul.f32 %v218_v14, %v171_v5 }
  0x13   : > { %283 = vst [vmem:[#allocation2 + $0x28] sm:$0xf] %v280_v7  ;;  %537 = vst [vmem:[#allocation3 + $0x98] sm:$0xf] %v280_v7  ;;  %225 = vrot.lane.b32.xlu0 %v215_v15, %s786_s19  ;;  %v224_v18 = vcombine.high %v215_v15, %v215_v15  ;;  %v268_v20 = vcombine.low %v215_v15, %v215_v15 }
  0x14   : > { %v254_v17 = vcombine.high %v220_v16, %v220_v16  ;;  %v284_v19 = vcombine.low %v220_v16, %v220_v16 }
  0x15   : > { %240 = vrot.lane.b32.xlu1 %v239_v8, %s785_s18 }
  0x17   : > { %255 = vrot.lane.b32.xlu0 %v220_v16, %s788_s21 }
  0x19   : > { %271 = vrot.lane.b32.xlu1 %v215_v15, %s787_s20 }
  0x1b   : > { %287 = vrot.lane.b32.xlu0 %v220_v16, %s789_s22 }
  0x1d   : > { %257 = vrot.lane.b32.xlu1 %v254_v17, %s788_s21 }
  0x1f   : > { %227 = vrot.lane.b32.xlu0 %v224_v18, %s786_s19 }
  0x21   : > { %300 = vrot.lane.b32.xlu1 %v224_v18, %s790_s23 }
  0x23   : > { %269 = vrot.lane.b32.xlu0 %v268_v20, %s787_s20 }
  0x25   : > { %285 = vrot.lane.b32.xlu1 %v284_v19, %s789_s22 }
  0x27   : > { %313 = vrot.lane.b32.xlu0 %v171_v5, %s791_s24 }
  0x29   : > { %311 = vrot.lane.b32.xlu1 %v239_v8, %s791_s24 }
  0x2b   : > { %298 = vrot.lane.b32.xlu0 %v215_v15, %s790_s23 }
  0x2d   : > { %324 = vrot.lane.b32.xlu1 %v220_v16, %s792_s25 }
  0x2f   : > { %326 = vrot.lane.b32.xlu0 %v254_v17, %s792_s25 }
  0x83   : > { %v243_v21 = vpop.permute.xlu1 %242 }
  0x85   : > { %v226_v24 = vpop.permute.xlu0 %225 }
  0x86   : > { %234 = vst.msk [vmem:[#allocation2] sm:$0xf] %vm233_vm13, %v226_v24  ;;  %vm328_vm13 = vcmask 908288  }
  0x87   : > { %v241_v22 = vpop.permute.xlu1 %240 }
  0x88   : > { %v245_v23 = vsel %vm244_vm1, %v241_v22, %v243_v21  ;;  %249 = vst.msk [vmem:[#allocation2] sm:$0xf0] %vm248_vm12, %v241_v22  ;;  %vm302_vm12 = vcmask 924672  }
  0x89   : > { %250 = vst [vmem:[#allocation2 + $0x8] sm:$0xf0] %v245_v23  ;;  %v256_v26 = vpop.permute.xlu0 %255 }
  0x8a   : > { %264 = vst.msk [vmem:[#allocation2 + $0x10] sm:$0xf] %vm263_vm14, %v256_v26  ;;  %vm333_vm14 = vcmask 904192  }
  0x8b   : > { %v272_v25 = vpop.permute.xlu1 %271 }
  0x8d   : > { %v288_v29 = vpop.permute.xlu0 %287 }
  0x8e   : > { %295 = vst.msk [vmem:[#allocation2 + $0x28] sm:$0xf0] %vm294_vm15, %v288_v29  ;;  %vm335_vm15 = vcmask 1044344  }
  0x8f   : > { %v258_v27 = vpop.permute.xlu1 %257  ;;  %297 = vst.msk [vmem:[#allocation2 + $0x28] sm:$0xf0] %vm296_vm0, %v784_v1  ;;  %v338_v47 = vld [vmem:[#allocation2] sm:$0xff]  ;;  %vm352_vm0 = vcmask 1043456  }
  0x90   : > { %v260_v28 = vsel %vm259_vm4, %v256_v26, %v258_v27 }
  0x91   : > { %265 = vst [vmem:[#allocation2 + $0x18] sm:$0xf] %v260_v28  ;;  %v228_v31 = vpop.permute.xlu0 %227 }
  0x92   : > { %v230_v32 = vsel %vm229_vm9, %v226_v24, %v228_v31 }
  0x93   : > { %v301_v30 = vpop.permute.xlu1 %300  ;;  %235 = vst [vmem:[#allocation2 + $0x8] sm:$0xf] %v230_v32 }
  0x94   : > { %308 = vst.msk [vmem:[#allocation2 + $0x38] sm:$0xf] %vm307_vm2, %v301_v30  ;;  %vm348_vm2 = vcmask 293888  }
  0x95   : > { %310 = vst.msk [vmem:[#allocation2 + $0x38] sm:$0xf] %vm309_vm3, %v784_v1  ;;  %v270_v35 = vpop.permute.xlu0 %269 }
  0x96   : > { %v274_v36 = vsel %vm273_vm11, %v270_v35, %v272_v25  ;;  %278 = vst.msk [vmem:[#allocation2 + $0x10] sm:$0xf0] %vm277_vm6, %v270_v35  ;;  %v343_v49 = vld [vmem:[#allocation2 + $0x28] sm:$0xff] }
  0x97   : > { %v286_v33 = vpop.permute.xlu1 %285  ;;  %279 = vst [vmem:[#allocation2 + $0x18] sm:$0xf0] %v274_v36 }
  0x98   : > { %v290_v34 = vsel %vm289_vm5, %v286_v33, %v288_v29 }
  0x99   : > { %293 = vst [vmem:[#allocation2 + $0x20] sm:$0xf0] %v290_v34  ;;  %v314_v38 = vpop.permute.xlu0 %313 }
  0x9a   : > { %321 = vst.msk [vmem:[#allocation2 + $0x38] sm:$0xf0] %vm320_vm8, %v314_v38  ;;  %v339_v43 = vld [vmem:[#allocation2 + $0x8] sm:$0xff]  ;;  %vm463_vm8 = vcmask 1047680  }
  0x9b   : > { %v312_v37 = vpop.permute.xlu1 %311  ;;  %323 = vst.msk [vmem:[#allocation2 + $0x38] sm:$0xf0] %vm322_vm10, %v784_v1  ;;  %vm450_vm10 = vcmask 1047688  }
  0x9c   : > { %v316_v39 = vsel %vm315_vm7, %v312_v37, %v314_v38 }
  0x9d   : > { %319 = vst [vmem:[#allocation2 + $0x30] sm:$0xf0] %v316_v39  ;;  %v299_v40 = vpop.permute.xlu0 %298  ;;  %v340_v41 = vld [vmem:[#allocation2 + $0x10] sm:$0xff] }
  0x9e   : > { %v303_v42 = vsel %vm302_vm12, %v299_v40, %v301_v30  ;;  %v341_v44 = vld [vmem:[#allocation2 + $0x18] sm:$0xff]  ;;  %v728_v48 = vpack.c.bf16 %v340_v41, %v338_v47  ;;  %v557_v47 = vld [vmem:[#allocation3 + $0x90] sm:$0xf] }
  0x9f   : > { %306 = vst [vmem:[#allocation2 + $0x30] sm:$0xf] %v303_v42  ;;  %v726_v45 = vpack.c.bf16 %v341_v44, %v339_v43  ;;  %v325_v46 = vpop.permute.xlu1 %324 }
  0xa0   : > { %v342_v54 = vld [vmem:[#allocation2 + $0x20] sm:$0xff] }
  0xa1   : > { %727 = vmatprep.subr.bf16.mxu0 %v726_v45  ;;  %v327_v50 = vpop.permute.xlu0 %326 }
  0xa2   : > { %729 = vmatpush1.bf16.msra.mxu0 %v728_v48  ;;  %v329_v51 = vsel %vm328_vm13, %v325_v46, %v327_v50  ;;  %334 = vst.msk [vmem:[#allocation2 + $0x48] sm:$0xf] %vm333_vm14, %v327_v50  ;;  %v345_v52 = vld [vmem:[#allocation2 + $0x38] sm:$0xff]  ;;  %vm476_vm14 = vcmask 1047672   ;;  %v558_v46 = vld [vmem:[#allocation3 + $0x98] sm:$0xf] }
  0xa3   : > { %332 = vst [vmem:[#allocation2 + $0x40] sm:$0xf] %v329_v51  ;;  %336 = vst.msk [vmem:[#allocation2 + $0x48] sm:$0xf] %vm335_vm15, %v784_v1  ;;  %v730_v53 = vpack.c.bf16 %v345_v52, %v343_v49  ;;  %vm487_vm15 = vcmask 1047560   ;;  %v538_v50 = vld [vmem:[%s954_s2] sm:$0xff] }
  0xa5   : > { %731 = vmatprep.subr.bf16.mxu0 %v730_v53 }
  0xa6   : > { %v344_v55 = vld [vmem:[#allocation2 + $0x30] sm:$0xff] }
  0xa7   : > { %v732_v56 = vpack.c.bf16 %v344_v55, %v342_v54 }
  0xa9   : > { %733 = vmatpush1.bf16.msra.mxu0 %v732_v56 }
  0xaa   : > { %v347_v57 = vld [vmem:[#allocation2 + $0x48] sm:$0xf]  ;;  %v346_v58 = vld [vmem:[#allocation2 + $0x40] sm:$0xf] }
  0xab   : > { %716 = vmatprep.subr.msk.mxu0 %vm352_vm0, %v347_v57 }
  0xad   : > { %717 = vmatpush1.msk.msra.mxu0 %vm352_vm0, %v346_v58 }
  0xae   : > { %718 = vmatmul.mubr.msk.f32.vlgmr.msra.gmra.mrb[0].mxu0 %vm348_vm2, %v337_v59 }
 0x181   : > { %v425_v60 = vpop.f32.mrb[0].mxu0 }
 0x182   : > { %vm430_vm3 = vcmp.gt.f32.partialorder %v425_v60, 0.0  ;;  %v432_v61 = vmul.f32 0.2, %v425_v60  ;;  %v427_v62 = vpop.f32.mrb[1].mxu0 }
 0x183   : > { %vm431_vm6 = vcmp.gt.f32.partialorder %v427_v62, 0.0  ;;  %v433_v63 = vmul.f32 0.2, %v427_v62 }
 0x184   : > { %v891_v0 = vsel %vm430_vm3, %v425_v60, %v432_v61 }
 0x185   : > { %v893_v2 = vsel %vm431_vm6, %v427_v62, %v433_v63  ;;  %456 = vrot.lane.b32.xlu0 %v891_v0, %s785_s18  ;;  %v436_v3 = vmul.f32 %v839_v9, %v891_v0  ;;  %v438_v5 = vmul.f32 %v842_v10, %v891_v0 }
 0x186   : > { %458 = vrot.lane.b32.xlu1 %v893_v2, %s785_s18  ;;  %v437_v4 = vmul.f32 %v845_v11, %v893_v2  ;;  %v439_v6 = vmul.f32 %v848_v12, %v893_v2 }
 0x189   : > { %443 = vrot.lane.b32.xlu0 %v436_v3, %s786_s19 }
 0x18a   : > { %445 = vrot.lane.b32.xlu1 %v437_v4, %s786_s19 }
 0x18d   : > { %469 = vrot.lane.b32.xlu0 %v438_v5, %s788_s21 }
 0x18e   : > { %471 = vrot.lane.b32.xlu1 %v439_v6, %s788_s21 }
 0x191   : > { %480 = vrot.lane.b32.xlu0 %v436_v3, %s787_s20 }
 0x192   : > { %482 = vrot.lane.b32.xlu1 %v437_v4, %s787_s20 }
 0x195   : > { %503 = vrot.lane.b32.xlu0 %v436_v3, %s790_s23 }
 0x196   : > { %492 = vrot.lane.b32.xlu1 %v438_v5, %s789_s22 }
 0x199   : > { %494 = vrot.lane.b32.xlu0 %v439_v6, %s789_s22 }
 0x19a   : > { %516 = vrot.lane.b32.xlu1 %v893_v2, %s791_s24 }
 0x19d   : > { %505 = vrot.lane.b32.xlu0 %v437_v4, %s790_s23 }
 0x19e   : > { %514 = vrot.lane.b32.xlu1 %v891_v0, %s791_s24 }
 0x1a1   : > { %527 = vrot.lane.b32.xlu0 %v439_v6, %s792_s25 }
 0x1a2   : > { %525 = vrot.lane.b32.xlu1 %v438_v5, %s792_s25 }
 0x1f7   : > { %v457_v7 = vpop.permute.xlu0 %456 }
 0x1f8   : > { %464 = vst.msk [vmem:[#allocation3 + $0x10] sm:$0xff] %vm463_vm8, %v457_v7  ;;  %v459_v8 = vpop.permute.xlu1 %458 }
 0x1f9   : > { %v460_v9 = vsel %vm244_vm1, %v457_v7, %v459_v8  ;;  %vm501_vm1 = vcmask 1048568  }
 0x1fb   : > { %v444_v10 = vpop.permute.xlu0 %443 }
 0x1fc   : > { %451 = vst.msk [vmem:[#allocation3] sm:$0xff] %vm450_vm10, %v444_v10  ;;  %v446_v11 = vpop.permute.xlu1 %445 }
 0x1fd   : > { %v447_v12 = vsel %vm229_vm9, %v444_v10, %v446_v11  ;;  %vm523_vm9 = vcmask 1048448  }
 0x1fe   : > { %v734_v13 = vpack.c.bf16 %v460_v9, %v447_v12 }
 0x1ff   : > { %v470_v14 = vpop.permute.xlu0 %469  ;;  %v541_v19 = vld [vmem:[#allocation3 + $0x10] sm:$0xff] }
 0x200   : > { %477 = vst.msk [vmem:[#allocation3 + $0x20] sm:$0xff] %vm476_vm14, %v470_v14  ;;  %v472_v15 = vpop.permute.xlu1 %471  ;;  %735 = vmatprep.subr.bf16.mxu1 %v734_v13 }
 0x201   : > { %v473_v16 = vsel %vm259_vm4, %v470_v14, %v472_v15  ;;  %vm512_vm4 = vcmask 1048456  }
 0x203   : > { %v481_v17 = vpop.permute.xlu0 %480  ;;  %v539_v18 = vld [vmem:[#allocation3] sm:$0xff] }
 0x204   : > { %488 = vst.msk [vmem:[#allocation3 + $0x30] sm:$0xff] %vm487_vm15, %v481_v17  ;;  %v483_v20 = vpop.permute.xlu1 %482  ;;  %v736_v21 = vpack.c.bf16 %v541_v19, %v539_v18 }
 0x205   : > { %v484_v22 = vsel %vm273_vm11, %v481_v17, %v483_v20  ;;  %vm534_vm11 = vcmask 1048440  }
 0x206   : > { %737 = vmatpush1.bf16.msra.mxu1 %v736_v21  ;;  %v738_v23 = vpack.c.bf16 %v484_v22, %v473_v16 }
 0x207   : > { %v504_v24 = vpop.permute.xlu0 %503  ;;  %v543_v27 = vld [vmem:[#allocation3 + $0x20] sm:$0xff] }
 0x208   : > { %v493_v25 = vpop.permute.xlu1 %492  ;;  %739 = vmatprep.subr.bf16.mxu1 %v738_v23 }
 0x20b   : > { %v495_v26 = vpop.permute.xlu0 %494  ;;  %v545_v28 = vld [vmem:[#allocation3 + $0x30] sm:$0xff] }
 0x20c   : > { %v496_v29 = vsel %vm289_vm5, %v493_v25, %v495_v26  ;;  %500 = vst.msk [vmem:[#allocation3 + $0x58] sm:$0xff] %vm289_vm5, %v495_v26  ;;  %v517_v30 = vpop.permute.xlu1 %516  ;;  %v740_v31 = vpack.c.bf16 %v545_v28, %v543_v27  ;;  %vm793_vm5 = vmmov 1  }
 0x20d   : > { %502 = vst.msk [vmem:[#allocation3 + $0x58] sm:$0xff] %vm501_vm1, %v784_v1  ;;  %v744_v41 = vpack.c.bf16 %v496_v29, %v891_v0 }
 0x20e   : > { %522 = vst.msk [vmem:[#allocation3 + $0x78] sm:$0xff] %vm315_vm7, %v517_v30  ;;  %741 = vmatpush1.bf16.msra.mxu1 %v740_v31 }
 0x20f   : > { %524 = vst.msk [vmem:[#allocation3 + $0x78] sm:$0xff] %vm523_vm9, %v784_v1  ;;  %v506_v32 = vpop.permute.xlu0 %505 }
 0x210   : > { %v507_v33 = vsel %vm302_vm12, %v504_v24, %v506_v32  ;;  %511 = vst.msk [vmem:[#allocation3 + $0x68] sm:$0xff] %vm302_vm12, %v506_v32  ;;  %v515_v34 = vpop.permute.xlu1 %514  ;;  %vm559_vm12 = vcmask 621568  }
 0x211   : > { %513 = vst.msk [vmem:[#allocation3 + $0x68] sm:$0xff] %vm512_vm4, %v784_v1  ;;  %v518_v35 = vsel %vm315_vm7, %v515_v34, %v517_v30  ;;  %vm751_vm7 = vmpackc.low %vm352_vm0, %vm793_vm5 }
 0x212   : > { %v748_v45 = vpack.c.bf16 %v518_v35, %v507_v33 }
 0x213   : > { %v528_v36 = vpop.permute.xlu0 %527 }
 0x214   : > { %533 = vst.msk [vmem:[#allocation3 + $0x88] sm:$0xff] %vm328_vm13, %v528_v36  ;;  %v526_v37 = vpop.permute.xlu1 %525  ;;  %v550_v38 = vld [vmem:[#allocation3 + $0x58] sm:$0xff] }
 0x215   : > { %535 = vst.msk [vmem:[#allocation3 + $0x88] sm:$0xff] %vm534_vm11, %v784_v1  ;;  %v529_v39 = vsel %vm328_vm13, %v526_v37, %v528_v36  ;;  %v742_v40 = vpack.c.bf16 %v550_v38, %v893_v2 }
 0x216   : > { %v554_v42 = vld [vmem:[#allocation3 + $0x78] sm:$0xff]  ;;  %v753_v49 = vpack.c.bf16 %v557_v47, %v529_v39 }
 0x217   : > { %743 = vmatprep.subr.bf16.mxu1 %v742_v40 }
 0x218   : > { %745 = vmatpush1.bf16.msra.mxu1 %v744_v41  ;;  %v552_v43 = vld [vmem:[#allocation3 + $0x68] sm:$0xff] }
 0x219   : > { %v746_v44 = vpack.c.bf16 %v554_v42, %v552_v43 }
 0x21b   : > { %747 = vmatprep.subr.bf16.mxu1 %v746_v44 }
 0x21c   : > { %749 = vmatpush1.bf16.msra.mxu1 %v748_v45  ;;  %v556_v48 = vld [vmem:[#allocation3 + $0x88] sm:$0xff] }
 0x21d   : > { %v750_v1 = vpack.c.bf16 %v558_v46, %v556_v48 }
 0x21f   : > { %752 = vmatprep.subr.msk.bf16.mxu1 %vm751_vm7, %v750_v1 }
 0x220   : > { %755 = vmatpush1.bf16.msk.msra.mxu1 %vm751_vm7, %v753_v49 }
 0x223   : > { %721 = vmatmul.mubr.msk.f32.vlgmr.msra.gmra.mrb[0].mxu1 %vm559_vm12, %v538_v50 }
 0x2f6   : > { %v635_v51 = vpop.f32.mrb[0].mxu1 }
 0x2f7   : > { %vm640_vm13 = vcmp.gt.f32.partialorder %v635_v51, 0.0  ;;  %v642_v52 = vmul.f32 0.2, %v635_v51  ;;  %v637_v53 = vpop.f32.mrb[1].mxu1 }
 0x2f8   : > { %vm641_vm0 = vcmp.gt.f32.partialorder %v637_v53, 0.0  ;;  %v643_v54 = vmul.f32 0.2, %v637_v53 }
 0x2f9   : > { %v644_v55 = vsel %vm640_vm13, %v635_v51, %v642_v52 }
 0x2fa   : > { %v645_v56 = vsel %vm641_vm0, %v637_v53, %v643_v54  ;;  %646 = vst [vmem:[%s170_s6] sm:$0xff] %v644_v55 }
 0x2fb   : > { %647 = vst [vmem:[%s170_s6 + $0x8] sm:$0xff] %v645_v56 }
 0x2fc PF: > { %s13_s12 = sadd.s32 1, %s782_s12  }
 0x2fd   : > { %p10_p4 = scmp.ge.s32.totalorder %s13_s12, 4  }
 0x2ff   :  { %12 = sbr.rel (!%p10_p4) target bundleno = 1 (0x1), region = 62 }

</bundles_post_ra>
